<compile_context>
chip_gen: v7x
topology: tpu7x:2x2x1
jax: 0.10.0
libtpu: 0.0.40
codegen_flags: <defaults>
</compile_context>

<pallas_src>
import functools

import jax
import jax.numpy as jnp
from jax.experimental import pallas as pl
from jax.experimental.pallas import tpu as pltpu

LANE = 128


def _round_up(a, m):
    return ((a + m - 1) // m) * m


def _activate(h, activation):
    """Activation used after the first and each hidden Linear (per the spec)."""
    if activation == "sigmoid":
        # Explicit exp-based logistic: exp goes to the EUP (free slot).
        return 1.0 / (1.0 + jnp.exp(-h))
    if activation == "GeLU":
        # Exact (erf-based) GeLU, matching torch.nn.GELU() default.
        return 0.5 * h * (1.0 + jax.lax.erf(h * 0.7071067811865476))
    # Default: ReLU.
    return jnp.maximum(h, 0.0)


def _gennet_kernel(*refs, equiv, skip, D, L, O, activation):
    refs = list(refs)
    o_ref = refs.pop()                                  # output (TB, O)
    x_ref = refs.pop(0)                                 # (TB, D)
    small_ref = refs.pop(0) if equiv else None          # (R, D) equiv params
    w0_ref = refs.pop(0)                                # (D, HP)
    rows_ref = refs.pop(0)                              # (L+O+2, HP) biases/wf
    whid_ref = refs.pop(0) if L > 0 else None           # (L, HP, HP)

    x = x_ref[...]                                      # (TB, D) f32

    if equiv:
        sp = small_ref
        # q = einsum('bi,ij,bj->b', x, bi, x): xb = x @ bi done on the VPU
        # (D=4 broadcast-MACs), then a masked lane reduce.
        xb = x[:, 0:1] * sp[0:1, :]
        for i in range(1, D):
            xb = xb + x[:, i:i + 1] * sp[i:i + 1, :]
        q = jnp.sum(xb * x, axis=-1, keepdims=True)     # (TB, 1)
        # equiv_layer: Linear(1, D)
        y = q * sp[D:D + 1, :] + sp[D + 1:D + 2, :]     # (TB, D)
        if skip:
            # skip_layer: Linear(D, D), again via VPU broadcast-MAC.
            for i in range(D):
                y = y + x[:, i:i + 1] * sp[D + 2 + i:D + 3 + i, :]
            y = y + sp[2 * D + 2:2 * D + 3, :]
    else:
        y = x

    # First Linear(D, H) + activation: K=D is tiny, so do it as D broadcast-
    # MACs on the VPU into a lane-dense (TB, HP) accumulator (HP = H -> 128).
    h = y[:, 0:1] * w0_ref[0:1, :]
    for i in range(1, D):
        h = h + y[:, i:i + 1] * w0_ref[i:i + 1, :]
    h = _activate(h + rows_ref[0:1, :], activation)     # (TB, HP)

    if activation != "ReLU":
        # Non-ReLU activations give nonzero values in the padded H..HP lanes;
        # re-zero them so the padded columns stay exact zeros for the MXU /
        # final lane reduce.  (ReLU keeps zeros as zeros -> mask not needed.)
        lane_ids = jax.lax.broadcasted_iota(jnp.int32, h.shape, 1)
        hp_mask = (lane_ids < rows_ref.shape[-1]) & (lane_ids >= 0)  # all-true
        h_real = lane_ids < jnp.int32(_H_STATIC[0])
        h = jnp.where(h_real & hp_mask, h, 0.0)

    # Hidden Linear(H, H) + activation layers on the MXU (aligned HPxHP f32
    # tiles; padded rows/cols of the weights are exact zeros).
    for l in range(L):                                  # static unroll (L=3)
        h = _activate(
            jnp.dot(h, whid_ref[l], preferred_element_type=jnp.float32)
            + rows_ref[1 + l:2 + l, :],
            activation)
        if activation != "ReLU":
            lane_ids = jax.lax.broadcasted_iota(jnp.int32, h.shape, 1)
            h = jnp.where(lane_ids < jnp.int32(_H_STATIC[0]), h, 0.0)

    # Final Linear(H, O): O is tiny -> VPU multiply + lane reduce, writing only
    # the O real output lanes (no 128-wide padded output store).
    for o in range(O):
        wf_row = rows_ref[1 + L + o:2 + L + o, :]       # (1, HP)
        col = (jnp.sum(h * wf_row, axis=-1, keepdims=True)
               + rows_ref[1 + L + O:2 + L + O, o:o + 1])
        o_ref[:, o:o + 1] = col


# Static hidden size communicated to the kernel for the non-ReLU lane mask
# (set by gennet_forward before tracing; a list so partial() closures see it).
_H_STATIC = [32]


def prepare_params(params, *, equiv=False, skip=False):
    """One-time packing of genNet params into kernel-ready arrays.

    Returns (packed_arrays, meta). Do this once; do NOT call per forward.
    """
    H, D = params["w0"].shape
    O = params["wf"].shape[0]
    L = int(params["whid"].shape[0])
    HP = _round_up(H, LANE)
    f32 = jnp.float32

    # First-layer weight, transposed to (D, HP) with the H real columns.
    w0p = jnp.zeros((D, HP), f32).at[:, :H].set(jnp.asarray(params["w0"], f32).T)

    # All (1, HP) rows packed into one array:
    #   row 0          : b0
    #   rows 1..L      : bhid[l]
    #   rows 1+L..L+O  : wf rows
    #   row  L+O+1     : bf (first O lanes)
    rows = jnp.zeros((L + O + 2, HP), f32)
    rows = rows.at[0, :H].set(jnp.asarray(params["b0"], f32))
    if L:
        rows = rows.at[1:1 + L, :H].set(jnp.asarray(params["bhid"], f32))
    rows = rows.at[1 + L:1 + L + O, :H].set(jnp.asarray(params["wf"], f32))
    rows = rows.at[1 + L + O, :O].set(jnp.asarray(params["bf"], f32))

    packed = {"w0p": w0p, "rows": rows}

    if L:
        whidp = jnp.zeros((L, HP, HP), f32)
        whidp = whidp.at[:, :H, :H].set(
            jnp.transpose(jnp.asarray(params["whid"], f32), (0, 2, 1)))
        packed["whidp"] = whidp

    if equiv:
        # Pack all D-wide equiv-path params into one small (R, D) array:
        #   rows 0..D-1        : bi
        #   row  D             : w_eq^T row   (Linear(1, D) weight)
        #   row  D+1           : b_eq
        #   rows D+2..2D+1     : w_sk^T       (if skip)
        #   row  2D+2          : b_sk         (if skip)
        R = 2 * D + 3 if skip else D + 2
        small = jnp.zeros((R, D), f32)
        small = small.at[0:D, :].set(jnp.asarray(params["bi"], f32))
        small = small.at[D, :].set(jnp.asarray(params["w_eq"], f32)[:, 0])
        small = small.at[D + 1, :].set(jnp.asarray(params["b_eq"], f32))
        if skip:
            small = small.at[D + 2:2 * D + 2, :].set(
                jnp.asarray(params["w_sk"], f32).T)
            small = small.at[2 * D + 2, :].set(jnp.asarray(params["b_sk"], f32))
        packed["small"] = small

    meta = dict(D=D, H=H, O=O, L=L, HP=HP)
    return packed, meta


def gennet_forward(x, packed, *, meta, equiv=False, skip=False,
                   activation="ReLU", tile_batch=4096):
    """Pallas genNet.forward. `packed`/`meta` come from prepare_params."""
    B, D = x.shape
    assert D == meta["D"]
    L, O, HP = meta["L"], meta["O"], meta["HP"]
    _H_STATIC[0] = meta["H"]

    TB = max(8, min(_round_up(tile_batch, 8), _round_up(B, 8)))
    Bp = _round_up(B, TB)
    xp = x.astype(jnp.float32)
    if Bp != B:
        xp = jnp.pad(xp, ((0, Bp - B), (0, 0)))

    inputs = [xp]
    in_specs = [pl.BlockSpec((TB, D), lambda i: (i, 0))]
    if equiv:
        small = packed["small"]
        inputs.append(small)
        in_specs.append(pl.BlockSpec(small.shape, lambda i: (0, 0)))
    inputs.append(packed["w0p"])
    in_specs.append(pl.BlockSpec((D, HP), lambda i: (0, 0)))
    inputs.append(packed["rows"])
    in_specs.append(pl.BlockSpec(packed["rows"].shape, lambda i: (0, 0)))
    if L > 0:
        inputs.append(packed["whidp"])
        in_specs.append(pl.BlockSpec((L, HP, HP), lambda i: (0, 0, 0)))

    kernel = functools.partial(_gennet_kernel, equiv=equiv, skip=skip,
                               D=D, L=L, O=O, activation=activation)
    out = pl.pallas_call(
        kernel,
        out_shape=jax.ShapeDtypeStruct((Bp, O), jnp.float32),
        grid=(Bp // TB,),
        in_specs=in_specs,
        out_specs=pl.BlockSpec((TB, O), lambda i: (i, 0)),
        compiler_params=pltpu.CompilerParams(
            dimension_semantics=("parallel",)),
    )(*inputs)
    # Rows B..Bp are padding (garbage values possible) -> slice them off.
    return out[:B]


def gennet_reference(x, params, *, equiv=False, skip=False, activation="ReLU"):
    """Pure-JAX reference mirroring the PyTorch forward."""
    x = x.astype(jnp.float32)
    if activation == "sigmoid":
        act = jax.nn.sigmoid
    elif activation == "GeLU":
        act = functools.partial(jax.nn.gelu, approximate=False)
    else:
        act = jax.nn.relu
    if equiv:
        q = jnp.einsum("bi,ij,bj->b", x, params["bi"], x)[:, None]
        y = q @ params["w_eq"].T + params["b_eq"]
        if skip:
            y = y + x @ params["w_sk"].T + params["b_sk"]
    else:
        y = x
    h = act(y @ params["w0"].T + params["b0"])
    for l in range(params["whid"].shape[0]):
        h = act(h @ params["whid"][l].T + params["bhid"][l])
    return h @ params["wf"].T + params["bf"]


def make_params(key, input_size=4, output_size=1, hidden_size=32,
                n_hidden_layers=3):
    """Deterministic synthetic init (PyTorch Linear-style uniform)."""
    def linear(k, fan_out, fan_in):
        kw, kb = jax.random.split(k)
        bound = 1.0 / jnp.sqrt(float(fan_in))
        w = jax.random.uniform(kw, (fan_out, fan_in), jnp.float32, -bound, bound)
        b = jax.random.uniform(kb, (fan_out,), jnp.float32, -bound, bound)
        return w, b

    keys = jax.random.split(key, 8 + n_hidden_layers)
    bi = jax.random.normal(keys[0], (input_size, input_size), jnp.float32)
    bi = 0.5 * (bi + bi.T)                                   # init='rand'
    w_eq, b_eq = linear(keys[1], input_size, 1)              # Linear(1, D)
    w_sk, b_sk = linear(keys[2], input_size, input_size)     # Linear(D, D)
    w0, b0 = linear(keys[3], hidden_size, input_size)
    whid, bhid = [], []
    for l in range(n_hidden_layers):
        w, b = linear(keys[4 + l], hidden_size, hidden_size)
        whid.append(w)
        bhid.append(b)
    wf, bf = linear(keys[4 + n_hidden_layers], output_size, hidden_size)
    return {
        "bi": bi, "w_eq": w_eq, "b_eq": b_eq, "w_sk": w_sk, "b_sk": b_sk,
        "w0": w0, "b0": b0,
        "whid": jnp.stack(whid), "bhid": jnp.stack(bhid),
        "wf": wf, "bf": bf,
    }


if __name__ == "__main__":
    key = jax.random.PRNGKey(0)
    kx1, kx3, kp = jax.random.split(key, 3)

    input_size, output_size, hidden_size, n_hidden_layers = 4, 1, 32, 3
    params = make_params(kp, input_size, output_size, hidden_size,
                         n_hidden_layers)

    # Tolerance: f32 accumulation-order differences (VPU front/back end in the
    # kernel vs XLA dots in the reference).
    TOL = 1e-4
    ok = True
    results = []

    # 1) Default config: equiv='False', skip='False' (plain ReLU MLP).
    x1 = jax.random.normal(kx1, (8, input_size), jnp.float32)
    packed1, meta1 = prepare_params(params, equiv=False, skip=False)
    fwd1 = jax.jit(functools.partial(gennet_forward, meta=meta1,
                                     equiv=False, skip=False))
    out1 = jax.block_until_ready(fwd1(x1, packed1))
    ref1 = gennet_reference(x1, params, equiv=False, skip=False)
    ok &= bool(jnp.allclose(out1, ref1, atol=TOL, rtol=TOL))
    assert out1.shape == (8, output_size)
    results.append(("default/relu", out1, ref1))

    # 2) Full config: equiv='True', skip='True'.
    packed2, meta2 = prepare_params(params, equiv=True, skip=True)
    fwd2 = jax.jit(functools.partial(gennet_forward, meta=meta2,
                                     equiv=True, skip=True))
    out2 = jax.block_until_ready(fwd2(x1, packed2))
    ref2 = gennet_reference(x1, params, equiv=True, skip=True)
    ok &= bool(jnp.allclose(out2, ref2, atol=TOL, rtol=TOL))
    assert out2.shape == (8, output_size)
    results.append(("equiv+skip", out2, ref2))

    # 3) equiv='True', skip='False', multi-tile batch grid (B=100, TB=32 ->
    #    4 grid steps, row-padded last tile) to exercise the pipeline.
    x3 = jax.random.normal(kx3, (100, input_size), jnp.float32)
    packed3, meta3 = prepare_params(params, equiv=True, skip=False)
    fwd3 = jax.jit(functools.partial(gennet_forward, meta=meta3,
                                     equiv=True, skip=False, tile_batch=32))
    out3 = jax.block_until_ready(fwd3(x3, packed3))
    ref3 = gennet_reference(x3, params, equiv=True, skip=False)
    ok &= bool(jnp.allclose(out3, ref3, atol=TOL, rtol=TOL))
    assert out3.shape == (100, output_size)
    results.append(("equiv multi-tile", out3, ref3))

    # 4) Sigmoid activation variant (plain MLP path), exercising the EUP path
    #    and the padded-lane masking for non-ReLU activations.
    fwd4 = jax.jit(functools.partial(gennet_forward, meta=meta1,
                                     equiv=False, skip=False,
                                     activation="sigmoid"))
    out4 = jax.block_until_ready(fwd4(x1, packed1))
    ref4 = gennet_reference(x1, params, equiv=False, skip=False,
                            activation="sigmoid")
    ok &= bool(jnp.allclose(out4, ref4, atol=TOL, rtol=TOL))
    assert out4.shape == (8, output_size)
    results.append(("sigmoid", out4, ref4))

    if ok:
        print("KERNEL_OK")
    else:
        for name, o, r in results:
            print(name, "max_abs_err =", float(jnp.max(jnp.abs(o - r))))
        raise SystemExit("mismatch vs reference")
</pallas_src>

<mosaic_0001>
module attributes {stable_mosaic.version = 11 : i64} {
  func.func @_gennet_kernel(%arg0: i32, %arg1: memref<8x4xf32, #tpu.memory_space<vmem>>, %arg2: memref<4x128xf32, #tpu.memory_space<vmem>>, %arg3: memref<6x128xf32, #tpu.memory_space<vmem>>, %arg4: memref<3x128x128xf32, #tpu.memory_space<vmem>>, %arg5: memref<8x1xf32, #tpu.memory_space<vmem>>) attributes {dimension_semantics = [#tpu.dimension_semantics<parallel>], iteration_bounds = array<i64: 1>, scalar_prefetch = 0 : i64, scratch_operands = 0 : i64, tpu.core_type = #tpu.core_type<tc>, window_params = [{transform_indices = @transform_0, window_bounds = array<i64: 8, 4>}, {pipeline_mode = #tpu.pipeline_mode<synchronous>, transform_indices = @transform_1, window_bounds = array<i64: 4, 128>}, {pipeline_mode = #tpu.pipeline_mode<synchronous>, transform_indices = @transform_2, window_bounds = array<i64: 6, 128>}, {pipeline_mode = #tpu.pipeline_mode<synchronous>, transform_indices = @transform_3, window_bounds = array<i64: 3, 128, 128>}, {transform_indices = @transform_4, window_bounds = array<i64: 8, 1>}]} {
    %c0 = arith.constant 0 : index
    %c0_0 = arith.constant 0 : index
    %0 = vector.load %arg1[%c0, %c0_0] : memref<8x4xf32, #tpu.memory_space<vmem>>, vector<8x4xf32>
    %1 = vector.extract_strided_slice %0 {offsets = [0, 0], sizes = [8, 1], strides = [1, 1]} : vector<8x4xf32> to vector<8x1xf32>
    %c0_1 = arith.constant 0 : index
    %c0_2 = arith.constant 0 : index
    %2 = vector.load %arg2[%c0_1, %c0_2] : memref<4x128xf32, #tpu.memory_space<vmem>>, vector<1x128xf32>
    %3 = vector.broadcast %1 : vector<8x1xf32> to vector<8x128xf32>
    %4 = vector.broadcast %2 : vector<1x128xf32> to vector<8x128xf32>
    %5 = arith.mulf %3, %4 : vector<8x128xf32>
    %6 = vector.extract_strided_slice %0 {offsets = [0, 1], sizes = [8, 1], strides = [1, 1]} : vector<8x4xf32> to vector<8x1xf32>
    %c1 = arith.constant 1 : index
    %c0_3 = arith.constant 0 : index
    %7 = vector.load %arg2[%c1, %c0_3] : memref<4x128xf32, #tpu.memory_space<vmem>>, vector<1x128xf32>
    %8 = vector.broadcast %6 : vector<8x1xf32> to vector<8x128xf32>
    %9 = vector.broadcast %7 : vector<1x128xf32> to vector<8x128xf32>
    %10 = arith.mulf %8, %9 : vector<8x128xf32>
    %11 = arith.addf %5, %10 : vector<8x128xf32>
    %12 = vector.extract_strided_slice %0 {offsets = [0, 2], sizes = [8, 1], strides = [1, 1]} : vector<8x4xf32> to vector<8x1xf32>
    %c2 = arith.constant 2 : index
    %c0_4 = arith.constant 0 : index
    %13 = vector.load %arg2[%c2, %c0_4] : memref<4x128xf32, #tpu.memory_space<vmem>>, vector<1x128xf32>
    %14 = vector.broadcast %12 : vector<8x1xf32> to vector<8x128xf32>
    %15 = vector.broadcast %13 : vector<1x128xf32> to vector<8x128xf32>
    %16 = arith.mulf %14, %15 : vector<8x128xf32>
    %17 = arith.addf %11, %16 : vector<8x128xf32>
    %18 = vector.extract_strided_slice %0 {offsets = [0, 3], sizes = [8, 1], strides = [1, 1]} : vector<8x4xf32> to vector<8x1xf32>
    %c3 = arith.constant 3 : index
    %c0_5 = arith.constant 0 : index
    %19 = vector.load %arg2[%c3, %c0_5] : memref<4x128xf32, #tpu.memory_space<vmem>>, vector<1x128xf32>
    %20 = vector.broadcast %18 : vector<8x1xf32> to vector<8x128xf32>
    %21 = vector.broadcast %19 : vector<1x128xf32> to vector<8x128xf32>
    %22 = arith.mulf %20, %21 : vector<8x128xf32>
    %23 = arith.addf %17, %22 : vector<8x128xf32>
    %c0_6 = arith.constant 0 : index
    %c0_7 = arith.constant 0 : index
    %24 = vector.load %arg3[%c0_6, %c0_7] : memref<6x128xf32, #tpu.memory_space<vmem>>, vector<1x128xf32>
    %25 = vector.broadcast %24 : vector<1x128xf32> to vector<8x128xf32>
    %26 = arith.addf %23, %25 : vector<8x128xf32>
    %cst = arith.constant 0.000000e+00 : f32
    %27 = vector.broadcast %cst : f32 to vector<8x128xf32>
    %28 = arith.maximumf %26, %27 : vector<8x128xf32>
    %c0_8 = arith.constant 0 : index
    %c0_9 = arith.constant 0 : index
    %c0_10 = arith.constant 0 : index
    %29 = vector.load %arg4[%c0_8, %c0_9, %c0_10] : memref<3x128x128xf32, #tpu.memory_space<vmem>>, vector<1x128x128xf32>
    %30 = vector.shape_cast %29 : vector<1x128x128xf32> to vector<128x128xf32>
    %cst_11 = arith.constant dense<0.000000e+00> : vector<8x128xf32>
    %31 = tpu.matmul %28, %30, %cst_11 {dimension_numbers = #tpu.dot_dimension_numbers<[1], [0], [0], [1], [0, 0, 1, 1], [], []>} : vector<8x128xf32>, vector<128x128xf32>, vector<8x128xf32> -> vector<8x128xf32>
    %c1_12 = arith.constant 1 : index
    %c0_13 = arith.constant 0 : index
    %32 = vector.load %arg3[%c1_12, %c0_13] : memref<6x128xf32, #tpu.memory_space<vmem>>, vector<1x128xf32>
    %33 = vector.broadcast %32 : vector<1x128xf32> to vector<8x128xf32>
    %34 = arith.addf %31, %33 : vector<8x128xf32>
    %cst_14 = arith.constant 0.000000e+00 : f32
    %35 = vector.broadcast %cst_14 : f32 to vector<8x128xf32>
    %36 = arith.maximumf %34, %35 : vector<8x128xf32>
    %c1_15 = arith.constant 1 : index
    %c0_16 = arith.constant 0 : index
    %c0_17 = arith.constant 0 : index
    %37 = vector.load %arg4[%c1_15, %c0_16, %c0_17] : memref<3x128x128xf32, #tpu.memory_space<vmem>>, vector<1x128x128xf32>
    %38 = vector.shape_cast %37 : vector<1x128x128xf32> to vector<128x128xf32>
    %cst_18 = arith.constant dense<0.000000e+00> : vector<8x128xf32>
    %39 = tpu.matmul %36, %38, %cst_18 {dimension_numbers = #tpu.dot_dimension_numbers<[1], [0], [0], [1], [0, 0, 1, 1], [], []>} : vector<8x128xf32>, vector<128x128xf32>, vector<8x128xf32> -> vector<8x128xf32>
    %c2_19 = arith.constant 2 : index
    %c0_20 = arith.constant 0 : index
    %40 = vector.load %arg3[%c2_19, %c0_20] : memref<6x128xf32, #tpu.memory_space<vmem>>, vector<1x128xf32>
    %41 = vector.broadcast %40 : vector<1x128xf32> to vector<8x128xf32>
    %42 = arith.addf %39, %41 : vector<8x128xf32>
    %cst_21 = arith.constant 0.000000e+00 : f32
    %43 = vector.broadcast %cst_21 : f32 to vector<8x128xf32>
    %44 = arith.maximumf %42, %43 : vector<8x128xf32>
    %c2_22 = arith.constant 2 : index
    %c0_23 = arith.constant 0 : index
    %c0_24 = arith.constant 0 : index
    %45 = vector.load %arg4[%c2_22, %c0_23, %c0_24] : memref<3x128x128xf32, #tpu.memory_space<vmem>>, vector<1x128x128xf32>
    %46 = vector.shape_cast %45 : vector<1x128x128xf32> to vector<128x128xf32>
    %cst_25 = arith.constant dense<0.000000e+00> : vector<8x128xf32>
    %47 = tpu.matmul %44, %46, %cst_25 {dimension_numbers = #tpu.dot_dimension_numbers<[1], [0], [0], [1], [0, 0, 1, 1], [], []>} : vector<8x128xf32>, vector<128x128xf32>, vector<8x128xf32> -> vector<8x128xf32>
    %c3_26 = arith.constant 3 : index
    %c0_27 = arith.constant 0 : index
    %48 = vector.load %arg3[%c3_26, %c0_27] : memref<6x128xf32, #tpu.memory_space<vmem>>, vector<1x128xf32>
    %49 = vector.broadcast %48 : vector<1x128xf32> to vector<8x128xf32>
    %50 = arith.addf %47, %49 : vector<8x128xf32>
    %cst_28 = arith.constant 0.000000e+00 : f32
    %51 = vector.broadcast %cst_28 : f32 to vector<8x128xf32>
    %52 = arith.maximumf %50, %51 : vector<8x128xf32>
    %c4 = arith.constant 4 : index
    %c0_29 = arith.constant 0 : index
    %53 = vector.load %arg3[%c4, %c0_29] : memref<6x128xf32, #tpu.memory_space<vmem>>, vector<1x128xf32>
    %54 = vector.broadcast %53 : vector<1x128xf32> to vector<8x128xf32>
    %55 = arith.mulf %52, %54 : vector<8x128xf32>
    %cst_30 = arith.constant dense<0.000000e+00> : vector<8xf32>
    %56 = vector.multi_reduction <add>, %55, %cst_30 [1] : vector<8x128xf32> to vector<8xf32>
    %57 = vector.shape_cast %56 : vector<8xf32> to vector<8x1xf32>
    %c5 = arith.constant 5 : index
    %c0_31 = arith.constant 0 : index
    %58 = vector.load %arg3[%c5, %c0_31] : memref<6x128xf32, #tpu.memory_space<vmem>>, vector<1x1xf32>
    %59 = vector.broadcast %58 : vector<1x1xf32> to vector<8x1xf32>
    %60 = arith.addf %57, %59 : vector<8x1xf32>
    %c0_32 = arith.constant 0 : index
    %c0_33 = arith.constant 0 : index
    %61 = vector.load %arg5[%c0_32, %c0_33] : memref<8x1xf32, #tpu.memory_space<vmem>>, vector<8x1xf32>
    tpu.vector_store %arg5[%c0_32, %c0_33], %60 {strides = array<i32>} : memref<8x1xf32, #tpu.memory_space<vmem>>, vector<8x1xf32>,
    return
  }
  func.func @transform_0(%arg0: i32) -> (i32, i32) {
    %c0_i32 = arith.constant 0 : i32
    %c0_i32_0 = arith.constant 0 : i32
    return %arg0, %c0_i32 : i32, i32
  }
  func.func @transform_1(%arg0: i32) -> (i32, i32) {
    %c0_i32 = arith.constant 0 : i32
    %c0_i32_0 = arith.constant 0 : i32
    %c0_i32_1 = arith.constant 0 : i32
    return %c0_i32, %c0_i32_0 : i32, i32
  }
  func.func @transform_2(%arg0: i32) -> (i32, i32) {
    %c0_i32 = arith.constant 0 : i32
    %c0_i32_0 = arith.constant 0 : i32
    %c0_i32_1 = arith.constant 0 : i32
    return %c0_i32, %c0_i32_0 : i32, i32
  }
  func.func @transform_3(%arg0: i32) -> (i32, i32, i32) {
    %c0_i32 = arith.constant 0 : i32
    %c0_i32_0 = arith.constant 0 : i32
    %c0_i32_1 = arith.constant 0 : i32
    %c0_i32_2 = arith.constant 0 : i32
    return %c0_i32, %c0_i32_0, %c0_i32_1 : i32, i32, i32
  }
  func.func @transform_4(%arg0: i32) -> (i32, i32) {
    %c0_i32 = arith.constant 0 : i32
    %c0_i32_0 = arith.constant 0 : i32
    return %arg0, %c0_i32 : i32, i32
  }
}

</mosaic_0001>

<bundles_post_ra>
// kernel: gennet_forward.1
= control target key start
LH: loop header
LB: loop body
LE: loop exit
PB: predicated region body
PF: predicated region fallthrough
CT: control target
= control target key end

     0   :  { %9 = vsyncpa [#allocation3], 0  ;;  %s659_s15 = smov [#allocation2]   ;;  %s772_s0 = inlined_call_operand.vmem [shape: f32[8,4], index: 0, kind: input, shape index: {}]   ;;  %s773_s1 = inlined_call_operand.vmem [shape: f32[4,128], index: 1, kind: input, shape index: {}]   ;;  %s774_s2 = inlined_call_operand.vmem [shape: f32[6,128], index: 2, kind: input, shape index: {}]   ;;  %s775_s3 = inlined_call_operand.hbm [shape: f32[3,128,128], index: 3, kind: input, shape index: {}]   ;;  %s776_s4 = inlined_call_operand.vmem [shape: f32[8,1], index: 4, kind: output, shape index: {}]  }
   0x1   :  { %s21_s16 = sshll.u32 %s659_s15, 4  ;;  %s635_s19 = scalar_lea.hbm %s775_s3, 6144  ;;  %s22_s16 = int_to_ptr.vmem [resolvable:$true] %s21_s16 }
   0x2   :  { %p636_p0 = scmp.ne.s32.totalorder %s775_s3, %s635_s19  ;;  %p639_p1 = scmp.lt.u32.totalorder %s635_s19, %s775_s3 }
   0x4   :  { %p641_p2 = pnand %p639_p1, %p636_p0 }
   0x6   :  { %644 = shalt.err (!%p641_p2)
}
   0x7   :  { %s645_s24 = scalar_lea.vmem %s22_s16, 6144  ;;  %p650_p4 = scmp.lt.s32.totalorder %s22_s16, %s22_s16 }
   0x8   :  { %p646_p3 = scmp.ne.s32.totalorder %s22_s16, %s645_s24  ;;  %p651_p5 = scmp.lt.s32.totalorder %s645_s24, %s645_s24 }
   0xa   :  { %p652_p6 = por %p651_p5, %p650_p4 }
   0xc   :  { %p653_p7 = pnand %p652_p6, %p646_p3 }
   0xe   :  { %656 = shalt.err (!%p653_p7)
}
   0xf   :  { %s660_s25 = smov 128   ;;  %s661_s26 = smov 8  }
  0x10   :  { %27 = dma.hbm_to_vmem [thread:$0]  %s775_s3, 6144, %s22_s16, [#allocation3], %s660_s25, %s660_s25, %s661_s26  }
  0x11   :  { %657 = dma.done.wait [#allocation3], 6144  }
  0x12   :  { %658 = vsyncadd [#allocation3], 4294961152  ;;  %v662_v0 = vmov 0   ;;  %v663_v1 = vmov 2   ;;  %v664_v2 = vmov 0.0|0.0   ;;  %v31_v3 = vld [vmem:[%s772_s0] sm:$0xff] }
  0x13   :  { %630 = vset.pattern.permute.xlu0 %v662_v0  ;;  %632 = vset.pattern.permute.xlu1 %v663_v1  ;;  %v83_v4 = vld [vmem:[#allocation2] sm:$0xff]  ;;  %v84_v5 = vld [vmem:[#allocation2 + $0x8] sm:$0xff]  ;;  %v85_v7 = vld [vmem:[#allocation2 + $0x10] sm:$0xff]  ;;  %v665_v12 = vmov 1   ;;  %v666_v13 = vmov 3   ;;  %vm667_vm0 = vmmov 0  }
  0x14   :  { %548 = vmatprep.subr.bf16.mxu0 %v664_v2  ;;  %572 = vmatprep.subr.bf16.mxu1 %v664_v2  ;;  %v549_v6 = vpack.c.bf16 %v84_v5, %v83_v4  ;;  %v86_v8 = vld [vmem:[#allocation2 + $0x18] sm:$0xff]  ;;  %v87_v10 = vld [vmem:[#allocation2 + $0x20] sm:$0xff]  ;;  %v88_v11 = vld [vmem:[#allocation2 + $0x28] sm:$0xff]  ;;  %v668_v20 = vmov 0.0   ;;  %vm375_vm1 = vcmask 7168  }
  0x15   :  { %35 = vperm.xlu0 %630, %v31_v3   ;;  %56 = vperm.xlu1 %632, %v31_v3   ;;  %v552_v9 = vpack.c.bf16 %v86_v8, %v85_v7  ;;  %v555_v14 = vpack.c.bf16 %v88_v11, %v87_v10  ;;  %v89_v15 = vld [vmem:[#allocation2 + $0x30] sm:$0xff]  ;;  %v90_v16 = vld [vmem:[#allocation2 + $0x38] sm:$0xff]  ;;  %v91_v18 = vld [vmem:[#allocation2 + $0x40] sm:$0xff] }
  0x16   :  { %550 = vmatpush3.bf16.msra.mxu0 %v549_v6  ;;  %v558_v17 = vpack.c.bf16 %v90_v16, %v89_v15  ;;  %v92_v19 = vld [vmem:[#allocation2 + $0x48] sm:$0xff]  ;;  %475 = vmatprep.mubr.msk.f32.mxu0 %vm667_vm0, %v668_v20  ;;  %v93_v22 = vld [vmem:[#allocation2 + $0x50] sm:$0xff]  ;;  %v94_v23 = vld [vmem:[#allocation2 + $0x58] sm:$0xff] }
  0x17   :  { %551 = vmatprep.subr.bf16.mxu0 %v664_v2  ;;  %510 = vmatprep.mubr.msk.f32.mxu1 %vm667_vm0, %v668_v20  ;;  %v561_v21 = vpack.c.bf16 %v92_v19, %v91_v18  ;;  %v176_v24 = vld [vmem:[#allocation2 + $0x80] sm:$0xff]  ;;  %v177_v25 = vld [vmem:[#allocation2 + $0x88] sm:$0xff]  ;;  %v178_v26 = vld [vmem:[#allocation2 + $0x90] sm:$0xff]  ;;  %v564_v27 = vpack.c.bf16 %v94_v23, %v93_v22 }
  0x18   :  { %v573_v28 = vpack.c.bf16 %v177_v25, %v176_v24  ;;  %v179_v29 = vld [vmem:[#allocation2 + $0x98] sm:$0xff]  ;;  %v95_v30 = vld [vmem:[#allocation2 + $0x60] sm:$0xff]  ;;  %v96_v31 = vld [vmem:[#allocation2 + $0x68] sm:$0xff] }
  0x19   :  { %631 = vset.pattern.permute.xlu0 %v665_v12  ;;  %633 = vset.pattern.permute.xlu1 %v666_v13  ;;  %v576_v32 = vpack.c.bf16 %v179_v29, %v178_v26  ;;  %v180_v33 = vld [vmem:[#allocation2 + $0xa0] sm:$0xff]  ;;  %v181_v34 = vld [vmem:[#allocation2 + $0xa8] sm:$0xff]  ;;  %v567_v35 = vpack.c.bf16 %v96_v31, %v95_v30  ;;  %v97_v36 = vld [vmem:[#allocation2 + $0x70] sm:$0xff] }
  0x1a   :  { %45 = vperm.xlu0 %631, %v31_v3   ;;  %67 = vperm.xlu1 %633, %v31_v3   ;;  %v98_v37 = vld [vmem:[#allocation2 + $0x78] sm:$0xff]  ;;  %v579_v38 = vpack.c.bf16 %v181_v34, %v180_v33  ;;  %v182_v39 = vld [vmem:[#allocation2 + $0xb0] sm:$0xff]  ;;  %v184_v43 = vld [vmem:[#allocation2 + $0xc0] sm:$0xff] }
  0x1b   :  { %553 = vmatpush3.bf16.msra.mxu0 %v552_v9  ;;  %574 = vmatpush3.bf16.msra.mxu1 %v573_v28  ;;  %v183_v40 = vld [vmem:[#allocation2 + $0xb8] sm:$0xff]  ;;  %v570_v41 = vpack.c.bf16 %v98_v37, %v97_v36  ;;  %v185_v44 = vld [vmem:[#allocation2 + $0xc8] sm:$0xff]  ;;  %v186_v46 = vld [vmem:[#allocation2 + $0xd0] sm:$0xff] }
  0x1c   :  { %554 = vmatprep.subr.bf16.mxu0 %v664_v2  ;;  %575 = vmatprep.subr.bf16.mxu1 %v664_v2  ;;  %v582_v42 = vpack.c.bf16 %v183_v40, %v182_v39  ;;  %v585_v45 = vpack.c.bf16 %v185_v44, %v184_v43  ;;  %v187_v47 = vld [vmem:[#allocation2 + $0xd8] sm:$0xff]  ;;  %v188_v49 = vld [vmem:[#allocation2 + $0xe0] sm:$0xff]  ;;  %v189_v50 = vld [vmem:[#allocation2 + $0xe8] sm:$0xff] }
  0x1d   :  { %v588_v48 = vpack.c.bf16 %v187_v47, %v186_v46  ;;  %v591_v51 = vpack.c.bf16 %v189_v50, %v188_v49  ;;  %v382_v54 = vld [vmem:[%s773_s1] ss:$0 sm:$0xff]  ;;  %v383_v55 = vld [vmem:[%s773_s1 + $0x1] ss:$0 sm:$0xff]  ;;  %v384_v56 = vld [vmem:[%s773_s1 + $0x2] ss:$0 sm:$0xff] }
  0x1e   :  { %634 = vset.pattern.permute.xlu0 %v666_v13  ;;  %v385_v58 = vld [vmem:[%s773_s1 + $0x3] ss:$0 sm:$0xff]  ;;  %v386_v3 = vld [vmem:[%s774_s2] ss:$0 sm:$0xff]  ;;  %v190_v7 = vld [vmem:[#allocation2 + $0xf0] sm:$0xff] }
  0x1f   :  { %556 = vmatpush3.bf16.msra.mxu0 %v555_v14  ;;  %577 = vmatpush3.bf16.msra.mxu1 %v576_v32  ;;  %v191_v8 = vld [vmem:[#allocation2 + $0xf8] sm:$0xff]  ;;  %v269_v10 = vld [vmem:[#allocation2 + $0x100] sm:$0xff]  ;;  %v270_v11 = vld [vmem:[#allocation2 + $0x108] sm:$0xff] }
  0x20   :  { %557 = vmatprep.subr.bf16.mxu0 %v664_v2  ;;  %578 = vmatprep.subr.bf16.mxu1 %v664_v2  ;;  %v594_v9 = vpack.c.bf16 %v191_v8, %v190_v7  ;;  %v271_v12 = vld [vmem:[#allocation2 + $0x110] sm:$0xff]  ;;  %v597_v13 = vpack.c.bf16 %v270_v11, %v269_v10  ;;  %v272_v14 = vld [vmem:[#allocation2 + $0x118] sm:$0xff]  ;;  %v273_v16 = vld [vmem:[#allocation2 + $0x120] sm:$0xff] }
  0x21   :  { %v600_v15 = vpack.c.bf16 %v272_v14, %v271_v12  ;;  %v275_v19 = vld [vmem:[#allocation2 + $0x130] sm:$0xff]  ;;  %v277_v22 = vld [vmem:[#allocation2 + $0x140] sm:$0xff]  ;;  %v278_v23 = vld [vmem:[#allocation2 + $0x148] sm:$0xff] }
  0x22   :  { %v609_v24 = vpack.c.bf16 %v278_v23, %v277_v22  ;;  %v279_v25 = vld [vmem:[#allocation2 + $0x150] sm:$0xff]  ;;  %v280_v26 = vld [vmem:[#allocation2 + $0x158] sm:$0xff]  ;;  %v281_v28 = vld [vmem:[#allocation2 + $0x160] sm:$0xff] }
  0x23   :  { %559 = vmatpush3.bf16.msra.mxu0 %v558_v17  ;;  %580 = vmatpush3.bf16.msra.mxu1 %v579_v38  ;;  %v274_v17 = vld [vmem:[#allocation2 + $0x128] sm:$0xff]  ;;  %v387_v31 = vld [vmem:[%s774_s2 + $0x1] ss:$0 sm:$0xff]  ;;  %v283_v36 = vld [vmem:[#allocation2 + $0x170] sm:$0xff] }
  0x24   :  { %560 = vmatprep.subr.bf16.mxu0 %v664_v2  ;;  %581 = vmatprep.subr.bf16.mxu1 %v664_v2  ;;  %v603_v18 = vpack.c.bf16 %v274_v17, %v273_v16  ;;  %v282_v29 = vld [vmem:[#allocation2 + $0x168] sm:$0xff]  ;;  %v284_v37 = vld [vmem:[#allocation2 + $0x178] sm:$0xff] }
  0x25   :  { %v615_v30 = vpack.c.bf16 %v282_v29, %v281_v28  ;;  %v618_v38 = vpack.c.bf16 %v284_v37, %v283_v36  ;;  %v388_v39 = vld [vmem:[%s774_s2 + $0x2] ss:$0 sm:$0xff]  ;;  %v389_v43 = vld [vmem:[%s774_s2 + $0x3] ss:$0 sm:$0xff]  ;;  %v390_v47 = vld [vmem:[%s774_s2 + $0x4] ss:$0 sm:$0xff] }
  0x26   :  { %v391_v50 = vld [vmem:[%s774_s2 + $0x5] ss:$0 sm:$0xff] }
  0x27   :  { %562 = vmatpush3.bf16.msra.mxu0 %v561_v21  ;;  %583 = vmatpush3.bf16.msra.mxu1 %v582_v42 }
  0x28   :  { %563 = vmatprep.subr.bf16.mxu0 %v664_v2  ;;  %584 = vmatprep.subr.bf16.mxu1 %v664_v2 }
  0x2b   :  { %565 = vmatpush3.bf16.msra.mxu0 %v564_v27  ;;  %586 = vmatpush3.bf16.msra.mxu1 %v585_v45  ;;  %v612_v27 = vpack.c.bf16 %v280_v26, %v279_v25 }
  0x2c   :  { %566 = vmatprep.subr.bf16.mxu0 %v664_v2  ;;  %587 = vmatprep.subr.bf16.mxu1 %v664_v2 }
  0x2f   :  { %568 = vmatpush3.bf16.msra.mxu0 %v567_v35  ;;  %589 = vmatpush3.bf16.msra.mxu1 %v588_v48 }
  0x30   :  { %569 = vmatprep.subr.bf16.mxu0 %v664_v2  ;;  %590 = vmatprep.subr.bf16.mxu1 %v664_v2 }
  0x33   :  { %571 = vmatpush3.bf16.msra.mxu0 %v570_v41  ;;  %592 = vmatpush3.bf16.msra.mxu1 %v591_v51 }
  0x34   :  { %596 = vmatprep.subr.bf16.mxu0 %v664_v2  ;;  %593 = vmatprep.subr.bf16.mxu1 %v664_v2 }
  0x37   :  { %595 = vmatpush3.bf16.msra.mxu1 %v594_v9 }
  0x94   :  { %v36_v52 = vpop.permute.xlu0 %35  ;;  %v57_v53 = vpop.permute.xlu1 %56 }
  0x95   :  { %v42_v60 = vmul.f32 %v382_v54, %v36_v52  ;;  %v63_v62 = vmul.f32 %v384_v56, %v57_v53 }
  0x99   :  { %v46_v57 = vpop.permute.xlu0 %45  ;;  %v68_v59 = vpop.permute.xlu1 %67 }
  0x9a   :  { %v52_v61 = vmul.f32 %v383_v55, %v46_v57  ;;  %v74_v0 = vmul.f32 %v385_v58, %v68_v59 }
  0x9c   :  { %v53_v63 = vadd.f32 %v52_v61, %v42_v60 }
  0x9e   :  { %v64_v1 = vadd.f32 %v63_v62, %v53_v63 }
  0xa0   :  { %v75_v4 = vadd.f32 %v74_v0, %v64_v1 }
  0xa2   :  { %v81_v5 = vadd.f32 %v386_v3, %v75_v4 }
  0xa4   :  { %v82_v6 = vmax.f32 %v81_v5, 0.0 }
  0xa6   :  { %476 = vmatmul.mubr.f32.vlgmr.msra.gmra.mrb[0].mxu0 %v82_v6 }
  0xa7   :  { %545 = vmatprep.mubr.msk.f32.mxu0 %vm667_vm0, %v668_v20  ;;  %598 = vmatpush3.bf16.msra.mxu0 %v597_v13  ;;  %v276_v20 = vld [vmem:[#allocation2 + $0x138] sm:$0xff] }
  0xa8   :  { %599 = vmatprep.subr.bf16.mxu0 %v664_v2  ;;  %v606_v21 = vpack.c.bf16 %v276_v20, %v275_v19 }
  0xab   :  { %601 = vmatpush3.bf16.msra.mxu0 %v600_v15 }
  0xac   :  { %602 = vmatprep.subr.bf16.mxu0 %v664_v2 }
  0xaf   :  { %604 = vmatpush3.bf16.msra.mxu0 %v603_v18 }
  0xb0   :  { %605 = vmatprep.subr.bf16.mxu0 %v664_v2 }
  0xb3   :  { %607 = vmatpush3.bf16.msra.mxu0 %v606_v21 }
  0xb4   :  { %608 = vmatprep.subr.bf16.mxu0 %v664_v2 }
  0xb7   :  { %610 = vmatpush3.bf16.msra.mxu0 %v609_v24 }
  0xb8   :  { %611 = vmatprep.subr.bf16.mxu0 %v664_v2 }
  0xbb   :  { %613 = vmatpush3.bf16.msra.mxu0 %v612_v27 }
  0xbc   :  { %614 = vmatprep.subr.bf16.mxu0 %v664_v2 }
  0xbf   :  { %616 = vmatpush3.bf16.msra.mxu0 %v615_v30 }
  0xc0   :  { %617 = vmatprep.subr.bf16.mxu0 %v664_v2 }
  0xc3   :  { %619 = vmatpush3.bf16.msra.mxu0 %v618_v38 }
 0x179   :  { %v170_v32 = vpop.f32.mrb[0].mxu0 }
 0x17a   :  { %v171_v33 = vadd.f32 %v387_v31, %v170_v32  ;;  %v477_v34 = vpop.f32.mrb[1].mxu0 }
 0x17c   :  { %v174_v35 = vmax.f32 %v171_v33, 0.0 }
 0x17e   :  { %511 = vmatmul.mubr.f32.vlgmr.msra.gmra.mrb[0].mxu1 %v174_v35 }
 0x251   :  { %v263_v40 = vpop.f32.mrb[0].mxu1 }
 0x252   :  { %v264_v41 = vadd.f32 %v388_v39, %v263_v40  ;;  %v512_v2 = vpop.f32.mrb[1].mxu1 }
 0x254   :  { %v267_v42 = vmax.f32 %v264_v41, 0.0 }
 0x256   :  { %546 = vmatmul.mubr.f32.vlgmr.msra.gmra.mrb[2].mxu0 %v267_v42 }
 0x329   :  { %v356_v44 = vpop.f32.mrb[2].mxu0 }
 0x32a   :  { %v357_v45 = vadd.f32 %v389_v43, %v356_v44  ;;  %v547_v46 = vpop.f32.mrb[3].mxu0 }
 0x32c   :  { %v360_v48 = vmax.f32 %v357_v45, 0.0 }
 0x32e   :  { %v366_v49 = vmul.f32 %v390_v47, %v360_v48 }
 0x330   :  { %367 = vadd.xlane.f32.xlu1 %v366_v49 }
 0x3bd   :  { %v368_v51 = vpop.xlane.xlu1 %367 }
 0x3be   :  { %v374_v52 = vadd.f32 %v391_v50, %v368_v51 }
 0x3c0   :  { %376 = vst.msk [vmem:[%s776_s4] sm:$0xff] %vm375_vm1, %v374_v52 }
 0x3c1   :  { %381 = vsyncpa [#allocation3], 1 }

</bundles_post_ra>
